<compile_context>
chip_gen: v7x
topology: tpu7x:2x2x1
jax: 0.10.0
libtpu: 0.0.40
codegen_flags: <defaults>
</compile_context>

<pallas_src>
import jax
import jax.numpy as jnp
from jax.experimental import pallas as pl
from jax.experimental.pallas import tpu as pltpu

LANES = 128
_TARGET_BLOCK_BYTES = 1 << 20  # ~1 MiB per input block per grid step


def _guess_num_tensorcores():
    """Best-effort TensorCore count (2 on v7x megacore, 1 on v5e/v6e)."""
    try:
        info = pltpu.get_tpu_info()
        for name in ("tensorcores_per_chip", "num_tensorcores", "num_cores",
                     "cores_per_chip", "core_count"):
            val = getattr(info, name, None)
            if val is not None:
                val = int(val)
                if 1 <= val <= 16:
                    return val
    except Exception:
        pass
    # Fallback 2: harmless on single-TC chips (at most one clamped, fully
    # masked duplicate tile + an 8 KiB partials buffer), required on v7x.
    return 2


def _tile_rows_for(rows, itemsize):
    """Largest (8,128)-aligned, dtype-sublane-aligned tile <= ~1 MiB."""
    target_rows = max(8, _TARGET_BLOCK_BYTES // (LANES * itemsize))  # 2048 f32, 4096 bf16
    packing = max(1, 4 // itemsize) * 8  # sublane packing: 8 f32, 16 bf16, 32 int8
    if rows >= target_rows:
        return target_rows
    if rows >= packing:
        return (rows // packing) * packing
    return rows  # tiny input: block spans the full rows dim (allowed)


def _make_kernel(tiles_per_shard, rows_valid, needs_mask, acc_rows):
    def kernel(pred_ref, label_ref, out_ref):
        c = pl.program_id(0)  # shard axis ("parallel", one per TensorCore)
        i = pl.program_id(1)  # tile-within-shard axis ("arbitrary" reduction)

        @pl.when(i == 0)
        def _():
            out_ref[...] = jnp.zeros_like(out_ref)

        p = jax.nn.sigmoid(pred_ref[...].astype(jnp.float32))
        d = p - label_ref[...].astype(jnp.float32)
        dd = d * d

        tile_rows, lanes = pred_ref.shape
        if needs_mask:
            # Logical (unclamped) tile index; the index_map may have clamped
            # the actual DMA to the last tile, so masked rows contribute 0.
            t = c * tiles_per_shard + i
            row = jax.lax.broadcasted_iota(jnp.int32, (tile_rows, lanes), 0)
            global_row = t * tile_rows + row  # row-index compare: no flat-index overflow
            dd = jnp.where(global_row < rows_valid, dd, 0.0)

        # Reduce this tile to a single (acc_rows,128) vreg slab with pure
        # vreg adds (reshape does not cross (8,128) tile boundaries), then
        # accumulate into the tiny VMEM-resident output block.
        out_ref[...] += dd.reshape(-1, acc_rows, lanes).sum(axis=0)[None]

    return kernel


def keypoint_mse_loss(pred, label):
    """Pallas equivalent of KeyPointMSELoss().forward(pred, label)."""
    assert pred.shape == label.shape
    n_elems = pred.size
    assert n_elems > 0

    # torch: label = label.to(pred.dtype)  (no-op when dtypes already match)
    if label.dtype != pred.dtype:
        label = label.astype(pred.dtype)

    pred_f = pred.reshape(-1)
    label_f = label.reshape(-1)

    rows = n_elems // LANES
    rem = n_elems - rows * LANES

    total = jnp.float32(0.0)

    # <128-element tail: plain-JAX sum (avoids a whole-array pad copy in HBM).
    if rem:
        p_tail = jax.nn.sigmoid(pred_f[rows * LANES:].astype(jnp.float32))
        d_tail = p_tail - label_f[rows * LANES:].astype(jnp.float32)
        total = total + jnp.sum(d_tail * d_tail)

    if rows > 0:
        if rem:
            pred2d = pred_f[: rows * LANES].reshape(rows, LANES)
            label2d = label_f[: rows * LANES].reshape(rows, LANES)
        else:
            pred2d = pred_f.reshape(rows, LANES)   # free bitcast reshape
            label2d = label_f.reshape(rows, LANES)

        itemsize = jnp.dtype(pred.dtype).itemsize
        tile_rows = _tile_rows_for(rows, itemsize)
        acc_rows = 8 if tile_rows % 8 == 0 else tile_rows

        tiles_total = pl.cdiv(rows, tile_rows)
        num_shards = max(1, min(_guess_num_tensorcores(), tiles_total))
        tiles_per_shard = pl.cdiv(tiles_total, num_shards)

        coverage_rows = num_shards * tiles_per_shard * tile_rows
        assert coverage_rows >= rows
        needs_mask = coverage_rows != rows
        needs_clamp = num_shards * tiles_per_shard > tiles_total
        assert needs_mask or not needs_clamp  # clamp always implies mask
        last_tile = tiles_total - 1

        def in_map(c, i):
            t = c * tiles_per_shard + i
            if needs_clamp:
                # Keep the DMA block index in range; the in-kernel mask zeroes
                # the contribution of any tile past the real data.
                t = jnp.minimum(t, last_tile)
            return (t, 0)

        kernel = _make_kernel(tiles_per_shard, rows, needs_mask, acc_rows)

        partials = pl.pallas_call(
            kernel,
            out_shape=jax.ShapeDtypeStruct((num_shards, acc_rows, LANES),
                                           jnp.float32),
            grid_spec=pltpu.PrefetchScalarGridSpec(
                num_scalar_prefetch=0,
                grid=(num_shards, tiles_per_shard),
                in_specs=[
                    pl.BlockSpec((tile_rows, LANES), in_map),
                    pl.BlockSpec((tile_rows, LANES), in_map),
                ],
                out_specs=pl.BlockSpec((1, acc_rows, LANES),
                                       lambda c, i: (c, 0, 0)),
            ),
            compiler_params=pltpu.CompilerParams(
                dimension_semantics=("parallel", "arbitrary")),
        )(pred2d, label2d)

        # Single tiny tree reduction of the (num_shards, 8, 128) partial sums.
        total = total + jnp.sum(partials)

    loss = total / jnp.float32(n_elems)
    return loss.astype(pred.dtype)


def _reference(pred, label):
    p = jax.nn.sigmoid(pred.astype(jnp.float32))
    l = label.astype(pred.dtype).astype(jnp.float32)
    return jnp.mean((p - l) ** 2).astype(pred.dtype)


if __name__ == "__main__":
    key = jax.random.PRNGKey(0)
    k1, k2 = jax.random.split(key)
    # NCHW: batch=2, keypoint-channels=4, heatmap 16x16
    pred = jax.random.normal(k1, (2, 4, 16, 16), dtype=jnp.float32)
    label = (jax.random.uniform(k2, (2, 4, 16, 16)) > 0.8).astype(jnp.float32)

    out = keypoint_mse_loss(pred, label)
    out = jax.block_until_ready(out)

    ref = _reference(pred, label)
    assert jnp.allclose(out, ref, atol=1e-6, rtol=1e-6), (out, ref)
    print("KERNEL_OK")
</pallas_src>

<mosaic_0001>
module attributes {stable_mosaic.version = 11 : i64} {
  func.func @kernel(%arg0: i32, %arg1: i32, %arg2: memref<16x128xf32, #tpu.memory_space<vmem>>, %arg3: memref<16x128xf32, #tpu.memory_space<vmem>>, %arg4: memref<1x8x128xf32, #tpu.memory_space<vmem>>) attributes {dimension_semantics = [#tpu.dimension_semantics<parallel>, #tpu.dimension_semantics<arbitrary>], iteration_bounds = array<i64: 1, 1>, scalar_prefetch = 0 : i64, scratch_operands = 0 : i64, tpu.core_type = #tpu.core_type<tc>, window_params = [{transform_indices = @transform_0, window_bounds = array<i64: 16, 128>}, {transform_indices = @transform_1, window_bounds = array<i64: 16, 128>}, {transform_indices = @transform_2, window_bounds = array<i64: 1, 8, 128>}]} {
    %c0_i32 = arith.constant 0 : i32
    %0 = arith.cmpi eq, %arg1, %c0_i32 : i32
    %1 = arith.extui %0 : i1 to i32
    %c0_i32_0 = arith.constant 0 : i32
    %2 = arith.cmpi ne, %1, %c0_i32_0 : i32
    scf.if %2 {
      %cst_11 = arith.constant 0.000000e+00 : f32
      %18 = vector.broadcast %cst_11 : f32 to vector<1x8x128xf32>
      %c0_12 = arith.constant 0 : index
      %c0_13 = arith.constant 0 : index
      %c0_14 = arith.constant 0 : index
      %19 = vector.load %arg4[%c0_12, %c0_13, %c0_14] : memref<1x8x128xf32, #tpu.memory_space<vmem>>, vector<1x8x128xf32>
      tpu.vector_store %arg4[%c0_12, %c0_13, %c0_14], %18 {strides = array<i32>} : memref<1x8x128xf32, #tpu.memory_space<vmem>>, vector<1x8x128xf32>,
    } else {
    }
    %c0 = arith.constant 0 : index
    %c0_1 = arith.constant 0 : index
    %3 = vector.load %arg2[%c0, %c0_1] : memref<16x128xf32, #tpu.memory_space<vmem>>, vector<16x128xf32>
    %4 = arith.negf %3 : vector<16x128xf32>
    %5 = math.exp %4 : vector<16x128xf32>
    %cst = arith.constant 1.000000e+00 : f32
    %6 = vector.broadcast %cst : f32 to vector<16x128xf32>
    %7 = arith.addf %6, %5 : vector<16x128xf32>
    %8 = arith.divf %6, %7 : vector<16x128xf32>
    %c0_2 = arith.constant 0 : index
    %c0_3 = arith.constant 0 : index
    %9 = vector.load %arg3[%c0_2, %c0_3] : memref<16x128xf32, #tpu.memory_space<vmem>>, vector<16x128xf32>
    %10 = arith.subf %8, %9 : vector<16x128xf32>
    %11 = arith.mulf %10, %10 : vector<16x128xf32>
    %c0_4 = arith.constant 0 : index
    %c0_5 = arith.constant 0 : index
    %c0_6 = arith.constant 0 : index
    %12 = vector.load %arg4[%c0_4, %c0_5, %c0_6] : memref<1x8x128xf32, #tpu.memory_space<vmem>>, vector<1x8x128xf32>
    %13 = vector.shape_cast %11 : vector<16x128xf32> to vector<2x8x128xf32>
    %cst_7 = arith.constant dense<0.000000e+00> : vector<8x128xf32>
    %14 = vector.multi_reduction <add>, %13, %cst_7 [0] : vector<2x8x128xf32> to vector<8x128xf32>
    %15 = vector.shape_cast %14 : vector<8x128xf32> to vector<1x8x128xf32>
    %16 = arith.addf %12, %15 : vector<1x8x128xf32>
    %c0_8 = arith.constant 0 : index
    %c0_9 = arith.constant 0 : index
    %c0_10 = arith.constant 0 : index
    %17 = vector.load %arg4[%c0_8, %c0_9, %c0_10] : memref<1x8x128xf32, #tpu.memory_space<vmem>>, vector<1x8x128xf32>
    tpu.vector_store %arg4[%c0_8, %c0_9, %c0_10], %16 {strides = array<i32>} : memref<1x8x128xf32, #tpu.memory_space<vmem>>, vector<1x8x128xf32>,
    return
  }
  func.func @transform_0(%arg0: i32, %arg1: i32) -> (i32, i32) {
    %c1_i32 = arith.constant 1 : i32
    %0 = arith.muli %arg0, %c1_i32 : i32
    %1 = arith.addi %0, %arg1 : i32
    %c0_i32 = arith.constant 0 : i32
    %c0_i32_0 = arith.constant 0 : i32
    return %1, %c0_i32 : i32, i32
  }
  func.func @transform_1(%arg0: i32, %arg1: i32) -> (i32, i32) {
    %c1_i32 = arith.constant 1 : i32
    %0 = arith.muli %arg0, %c1_i32 : i32
    %1 = arith.addi %0, %arg1 : i32
    %c0_i32 = arith.constant 0 : i32
    %c0_i32_0 = arith.constant 0 : i32
    return %1, %c0_i32 : i32, i32
  }
  func.func @transform_2(%arg0: i32, %arg1: i32) -> (i32, i32, i32) {
    %c0_i32 = arith.constant 0 : i32
    %c0_i32_0 = arith.constant 0 : i32
    %c0_i32_1 = arith.constant 0 : i32
    return %arg0, %c0_i32, %c0_i32_0 : i32, i32, i32
  }
}

</mosaic_0001>

<bundles_post_ra>
// kernel: tpu_custom_call.1
= control target key start
LH: loop header
LB: loop body
LE: loop exit
PB: predicated region body
PF: predicated region fallthrough
CT: control target
= control target key end

     0   :  { %7 = vsyncpa [#allocation3], 0  ;;  %s241_s0 = inlined_call_operand.hbm [shape: f32[16,128], index: 0, kind: input, shape index: {}]   ;;  %s242_s1 = inlined_call_operand.hbm [shape: f32[16,128], index: 1, kind: input, shape index: {}]   ;;  %s243_s2 = inlined_call_operand.hbm [shape: f32[1,8,128], index: 2, kind: output, shape index: {}]  }
   0x1   :  { %8 = vsyncpa [#allocation6], 0 }
   0x2   :  { %9 = vsyncpa [#allocation4], 0  ;;  %s185_s9 = smov [#allocation2]   ;;  %s113_s13 = scalar_lea.hbm %s241_s0, 256 }
   0x3   :  { %s19_s10 = sshll.u32 %s185_s9, 4  ;;  %p114_p0 = scmp.ne.s32.totalorder %s241_s0, %s113_s13  ;;  %s20_s10 = int_to_ptr.vmem [resolvable:$true] %s19_s10 }
   0x4   :  { %p117_p1 = scmp.lt.u32.totalorder %s113_s13, %s241_s0 }
   0x6   :  { %p119_p2 = pnand %p117_p1, %p114_p0 }
   0x8   :  { %122 = shalt.err (!%p119_p2)
}
   0x9   :  { %s123_s18 = scalar_lea.vmem %s20_s10, 256  ;;  %p128_p4 = scmp.lt.s32.totalorder %s20_s10, %s20_s10 }
   0xa   :  { %p124_p3 = scmp.ne.s32.totalorder %s20_s10, %s123_s18  ;;  %p129_p5 = scmp.lt.s32.totalorder %s123_s18, %s123_s18 }
   0xc   :  { %p130_p6 = por %p129_p5, %p128_p4 }
   0xe   :  { %p131_p7 = pnand %p130_p6, %p124_p3 }
  0x10   :  { %134 = shalt.err (!%p131_p7)
}
  0x11   :  { %s186_s19 = smov 128   ;;  %s187_s20 = smov 8  }
  0x12   :  { %25 = dma.hbm_to_vmem [thread:$0]  %s241_s0, 256, %s20_s10, [#allocation3], %s186_s19, %s186_s19, %s187_s20  }
  0x13   :  { %s188_s23 = smov [#allocation5]   ;;  %s135_s27 = scalar_lea.hbm %s242_s1, 256 }
  0x14   :  { %s35_s24 = sshll.u32 %s188_s23, 4  ;;  %p136_p8 = scmp.ne.s32.totalorder %s242_s1, %s135_s27  ;;  %s36_s24 = int_to_ptr.vmem [resolvable:$true] %s35_s24 }
  0x15   :  { %p139_p9 = scmp.lt.u32.totalorder %s135_s27, %s242_s1 }
  0x17   :  { %p141_p10 = pnand %p139_p9, %p136_p8 }
  0x19   :  { %144 = shalt.err (!%p141_p10)
}
  0x1a   :  { %s145_s4 = scalar_lea.vmem %s36_s24, 256  ;;  %p150_p12 = scmp.lt.s32.totalorder %s36_s24, %s36_s24 }
  0x1b   :  { %p146_p11 = scmp.ne.s32.totalorder %s36_s24, %s145_s4  ;;  %p151_p13 = scmp.lt.s32.totalorder %s145_s4, %s145_s4 }
  0x1d   :  { %p152_p0 = por %p151_p13, %p150_p12 }
  0x1f   :  { %p153_p1 = pnand %p152_p0, %p146_p11 }
  0x21   :  { %156 = shalt.err (!%p153_p1)
}
  0x22   :  { %41 = dma.hbm_to_vmem [thread:$0]  %s242_s1, 256, %s36_s24, [#allocation6], %s186_s19, %s186_s19, %s187_s20  }
  0x23   :  { %179 = dma.done.wait [#allocation3], 256  }
  0x24   :  { %180 = vsyncadd [#allocation3], 4294967040 }
  0x25   :  { %181 = dma.done.wait [#allocation6], 256  }
  0x26   :  { %182 = vsyncadd [#allocation6], 4294967040  ;;  %v57_v0 = vld [vmem:[#allocation2] sm:$0xff]  ;;  %v58_v1 = vld [vmem:[#allocation2 + $0x8] sm:$0xff]  ;;  %s189_s1 = smov [#allocation7]  }
  0x27   :  { %v97_v2 = vmul.f32 -1.442695, %v57_v0  ;;  %v98_v3 = vmul.f32 -1.442695, %v58_v1  ;;  %v71_v8 = vld [vmem:[#allocation5] sm:$0xff]  ;;  %v72_v9 = vld [vmem:[#allocation5 + $0x8] sm:$0xff] }
  0x28   :  { %s87_s6 = sshll.u32 %s189_s1, 4  ;;  %s88_s6 = int_to_ptr.vmem [resolvable:$true] %s87_s6 }
  0x29   :  { %105 = vpow2.f32 %v97_v2  ;;  %s157_s7 = scalar_lea.vmem %s88_s6, 128  ;;  %p162_p3 = scmp.lt.s32.totalorder %s88_s6, %s88_s6 }
  0x2a   :  { %107 = vpow2.f32 %v98_v3  ;;  %p158_p2 = scmp.ne.s32.totalorder %s88_s6, %s157_s7  ;;  %p163_p4 = scmp.lt.s32.totalorder %s157_s7, %s157_s7 }
  0x2c   :  { %p164_p5 = por %p163_p4, %p162_p3 }
  0x2e   :  { %p165_p6 = pnand %p164_p5, %p158_p2 }
  0x33   :  { %v106_v4 = vpop.eup %105 }
  0x34   :  { %v108_v5 = vpop.eup %107  ;;  %v65_v6 = vadd.f32 1.0, %v106_v4 }
  0x35   :  { %v66_v7 = vadd.f32 1.0, %v108_v5 }
  0x36   :  { %109 = vrcp.f32 %v65_v6 }
  0x37   :  { %111 = vrcp.f32 %v66_v7 }
  0x40   :  { %v110_v10 = vpop.eup %109 }
  0x41   :  { %v112_v11 = vpop.eup %111  ;;  %v73_v12 = vsub.f32 %v110_v10, %v71_v8 }
  0x42   :  { %v74_v13 = vsub.f32 %v112_v11, %v72_v9 }
  0x43   :  { %v75_v14 = vmul.f32 %v73_v12, %v73_v12 }
  0x44   :  { %v76_v15 = vmul.f32 %v74_v13, %v74_v13 }
  0x46   :  { %v78_v16 = vadd.f32 %v76_v15, %v75_v14 }
  0x48   :  { %80 = vst [vmem:[#allocation7] sm:$0xff] %v78_v16 }
  0x49   :  { %168 = shalt.err (!%p165_p6)
}
  0x4a   :  { %s169_s10 = scalar_lea.hbm %s243_s2, 128 }
  0x4b   :  { %p170_p7 = scmp.ne.s32.totalorder %s243_s2, %s169_s10  ;;  %p173_p8 = scmp.lt.u32.totalorder %s169_s10, %s243_s2 }
  0x4d   :  { %p175_p9 = pnand %p173_p8, %p170_p7 }
  0x4f   :  { %178 = shalt.err (!%p175_p9)
}
  0x50   :  { %90 = dma.vmem_to_hbm [thread:$0]  %s88_s6, 128, %s243_s2, [#allocation4]  }
  0x51   :  { %183 = dma.done.wait [#allocation4], 128  }
  0x52   :  { %184 = vsyncadd [#allocation4], 4294967168 }
  0x53   :  { %94 = vsyncpa [#allocation3], 1 }
  0x54   :  { %95 = vsyncpa [#allocation6], 1 }
  0x55   :  { %96 = vsyncpa [#allocation4], 1 }

</bundles_post_ra>
